<compile_context>
chip_gen: v5e
topology: v5e:2x2
jax: 0.10.0
libtpu: 0.0.40
codegen_flags: <defaults>
</compile_context>

<pallas_src>
import math

import jax
import jax.numpy as jnp
from jax.experimental import pallas as pl
from jax.experimental.pallas import tpu as pltpu


def make_pos_embed(hidden_dim: int, max_len: int = 8) -> jnp.ndarray:
    """Deterministic buffer init, exactly mirroring the PyTorch __init__."""
    assert hidden_dim == max_len, "reference module requires hidden_dim == max_len"
    assert hidden_dim % 2 == 0, "reference module requires even hidden_dim"
    pos_embed = jnp.zeros((max_len, hidden_dim), dtype=jnp.float32)
    position = jnp.arange(0, hidden_dim, dtype=jnp.float32)[:, None]
    div_term = jnp.exp(
        jnp.arange(0, hidden_dim, 2, dtype=jnp.float32)
        * (-math.log(10000.0) / hidden_dim)
    )
    pos_embed = pos_embed.at[:, 0::2].set(jnp.sin(position * div_term))
    pos_embed = pos_embed.at[:, 1::2].set(jnp.cos(position * div_term))
    return pos_embed[None]  # (1, max_len, hidden_dim)


def _add_pe_kernel(x_ref, pe_ref, o_ref):
    # x_ref : (TB, L*E) slab of token embeddings (lane-dense minor dim).
    # pe_ref: (1,  L*E) whole-array VMEM-resident positional-embedding row,
    #         broadcast over the TB rows (HBM-bound kernel; broadcast is free).
    o_ref[...] = x_ref[...] + pe_ref[...]


def _chip_params():
    """(target_block_bytes, vmem_limit_bytes_or_None, tensorcores_per_chip)."""
    kind = jax.devices()[0].device_kind.lower()
    if "v7" in kind:
        # 64 MiB physical VMEM, 2 TCs/chip: 8 MiB blocks need an explicit
        # scoped limit (2x x + 2x out pipeline buffers ~ 32 MiB).
        return 8 << 20, 48 << 20, 2
    if "v6" in kind:
        # 128 MiB physical, 32 MiB default scoped: raise the limit for 8 MiB blocks.
        return 8 << 20, 64 << 20, 1
    if "v5e" in kind or "v5 lite" in kind or "v5lite" in kind:
        # 16 MiB default scoped VMEM: 2 MiB blocks keep double-buffered x/out
        # plus pe and internal scratch comfortably inside it; per-step overhead
        # is already <~4% of DMA time at ~0.8 TB/s.
        return 2 << 20, None, 1
    return 4 << 20, None, 1


def _sublane_multiple(dtype) -> int:
    """Sublane packing factor: 8 rows for 4-byte, 16 for 2-byte, 32 for 1-byte."""
    return {4: 8, 2: 16, 1: 32}.get(jnp.dtype(dtype).itemsize, 8)


def _pick_batch_tile(n, row_bytes, sub, num_cores, target_block_bytes):
    """Returns (tb, n_padded).

    tb is a multiple of the sublane packing factor (or n itself when n is
    tiny), chosen so a (tb, L*E) block stays within target_block_bytes while
    producing at least `num_cores` grid steps when legally possible (v7x
    dual-TC sharding).  n_padded is n rounded up to a multiple of tb.
    """
    if n <= sub:
        # Too small to split into sublane-aligned tiles; one full-extent block.
        return n, n
    rows_budget = max(sub, (target_block_bytes // max(row_bytes, 1)) // sub * sub)
    per_core = -(-n // num_cores)            # ceil(n / num_cores)
    per_core = -(-per_core // sub) * sub     # round up to sublane multiple
    tb = max(sub, min(rows_budget, per_core))
    n_pad = -(-n // tb) * tb
    return tb, n_pad


def sinusoidal_encoding_forward(x: jnp.ndarray, pos_embed: jnp.ndarray) -> jnp.ndarray:
    """x: (N, L, E); pos_embed: (1, max_len, E). Returns x + pos_embed[:, :L]."""
    N, L, E = x.shape
    _, max_len, E_pe = pos_embed.shape
    assert E == E_pe and L <= max_len

    # Lane-dense layout: row-major flatten (L, E) -> L*E so the minor dim is a
    # multiple of 128 (full-width vst) instead of E.  Free reshape on
    # contiguous data.
    LE = L * E
    x2 = x.reshape(N, LE)
    pe2 = pos_embed[:, :L, :].reshape(1, LE)  # constant buffer, sliced once here

    target_block_bytes, vmem_limit, num_cores = _chip_params()
    sub = _sublane_multiple(x2.dtype)
    tb, n_pad = _pick_batch_tile(
        N, LE * x2.dtype.itemsize, sub, num_cores, target_block_bytes
    )
    if n_pad != N:
        # Pad up to a tile multiple instead of falling back to one giant block.
        x2 = jnp.pad(x2, ((0, n_pad - N), (0, 0)))

    cp_kwargs = dict(dimension_semantics=("parallel",))
    if vmem_limit is not None:
        cp_kwargs["vmem_limit_bytes"] = vmem_limit

    out2 = pl.pallas_call(
        _add_pe_kernel,
        out_shape=jax.ShapeDtypeStruct((n_pad, LE), x2.dtype),
        grid_spec=pltpu.PrefetchScalarGridSpec(
            num_scalar_prefetch=0,
            grid=(n_pad // tb,),
            in_specs=[
                # TB batch rows per grid step, lane-dense L*E minor dim.
                pl.BlockSpec((tb, LE), lambda i: (i, 0)),
                # Tiny constant pe row: whole-array resident in VMEM, one DMA,
                # no pipeline buffer.
                pl.BlockSpec(memory_space=pltpu.MemorySpace.VMEM),
            ],
            out_specs=pl.BlockSpec((tb, LE), lambda i: (i, 0)),
        ),
        compiler_params=pltpu.CompilerParams(**cp_kwargs),
    )(x2, pe2)

    return out2[:N].reshape(N, L, E)


if __name__ == "__main__":
    # hidden_dim must equal max_len due to the reference module's quirk.
    N, L, E, MAX_LEN = 2, 8, 32, 32

    key = jax.random.PRNGKey(0)
    x = jax.random.normal(key, (N, L, E), dtype=jnp.float32)

    pos_embed = make_pos_embed(hidden_dim=E, max_len=MAX_LEN)

    # Reference computed BEFORE the kernel call (no aliasing, but good hygiene).
    ref = x + pos_embed[:, :L]

    out = sinusoidal_encoding_forward(x, pos_embed)
    out = jax.block_until_ready(out)

    assert out.shape == (N, L, E)
    assert jnp.allclose(out, ref, atol=1e-6), "mismatch vs reference"

    print("KERNEL_OK")
</pallas_src>

<mosaic_0001>
module attributes {stable_mosaic.version = 11 : i64} {
  func.func @_add_pe_kernel(%arg0: i32, %arg1: memref<2x256xf32, #tpu.memory_space<vmem>>, %arg2: memref<1x256xf32, #tpu.memory_space<vmem>>, %arg3: memref<2x256xf32, #tpu.memory_space<vmem>>) attributes {dimension_semantics = [#tpu.dimension_semantics<parallel>], iteration_bounds = array<i64: 1>, scalar_prefetch = 0 : i64, scratch_operands = 0 : i64, tpu.core_type = #tpu.core_type<tc>, window_params = [{transform_indices = @transform_0, window_bounds = array<i64: 2, 256>}, {pipeline_mode = #tpu.pipeline_mode<synchronous>, transform_indices = @transform_1, window_bounds = array<i64: 1, 256>}, {transform_indices = @transform_2, window_bounds = array<i64: 2, 256>}]} {
    %c0 = arith.constant 0 : index
    %c0_0 = arith.constant 0 : index
    %0 = vector.load %arg1[%c0, %c0_0] : memref<2x256xf32, #tpu.memory_space<vmem>>, vector<2x256xf32>
    %c0_1 = arith.constant 0 : index
    %c0_2 = arith.constant 0 : index
    %1 = vector.load %arg2[%c0_1, %c0_2] : memref<1x256xf32, #tpu.memory_space<vmem>>, vector<1x256xf32>
    %2 = vector.broadcast %1 : vector<1x256xf32> to vector<2x256xf32>
    %3 = arith.addf %0, %2 : vector<2x256xf32>
    %c0_3 = arith.constant 0 : index
    %c0_4 = arith.constant 0 : index
    %4 = vector.load %arg3[%c0_3, %c0_4] : memref<2x256xf32, #tpu.memory_space<vmem>>, vector<2x256xf32>
    tpu.vector_store %arg3[%c0_3, %c0_4], %3 {strides = array<i32>} : memref<2x256xf32, #tpu.memory_space<vmem>>, vector<2x256xf32>,
    return
  }
  func.func @transform_0(%arg0: i32) -> (i32, i32) {
    %c0_i32 = arith.constant 0 : i32
    %c0_i32_0 = arith.constant 0 : i32
    return %arg0, %c0_i32 : i32, i32
  }
  func.func @transform_1(%arg0: i32) -> (i32, i32) {
    %c0_i32 = arith.constant 0 : i32
    %c0_i32_0 = arith.constant 0 : i32
    %c0_i32_1 = arith.constant 0 : i32
    return %c0_i32, %c0_i32_0 : i32, i32
  }
  func.func @transform_2(%arg0: i32) -> (i32, i32) {
    %c0_i32 = arith.constant 0 : i32
    %c0_i32_0 = arith.constant 0 : i32
    return %arg0, %c0_i32 : i32, i32
  }
}

</mosaic_0001>

<bundles_post_ra>
// kernel: tpu_custom_call.1
= control target key start
LH: loop header
LB: loop body
LE: loop exit
PB: predicated region body
PF: predicated region fallthrough
CT: control target
= control target key end

     0   :  { %7 = vsyncpa [#allocation3], 0  ;;  %s177_s0 = inlined_call_operand.hbm [shape: f32[2,256], index: 0, kind: input, shape index: {}]   ;;  %s178_s1 = inlined_call_operand.hbm [shape: f32[1,256], index: 1, kind: input, shape index: {}]   ;;  %s179_s2 = inlined_call_operand.hbm [shape: f32[2,256], index: 2, kind: output, shape index: {}]  }
   0x1   :  { %8 = vsyncpa [#allocation6], 0 }
   0x2   :  { %9 = vsyncpa [#allocation4], 0  ;;  %s15_s11 = sshll.u32 %s177_s0, 4  ;;  %s150_s12 = smov [#allocation2]   ;;  %s16_s11 = int_to_ptr.hbm [resolvable:$true] %s15_s11 }
   0x3   :  { %s17_s13 = sshll.u32 %s150_s12, 4  ;;  %s26_s16 = sshll.u32 %s178_s1, 4  ;;  %s18_s13 = int_to_ptr.vmem [resolvable:$true] %s17_s13  ;;  %s27_s16 = int_to_ptr.hbm [resolvable:$true] %s26_s16 }
   0x4   :  { %20 = dma.hbm_to_vmem [thread:$0]  %s16_s11, 64, %s18_s13, [#allocation3]  }
   0x5   :  { %s151_s17 = smov [#allocation5]  }
   0x6   :  { %s28_s18 = sshll.u32 %s151_s17, 4  ;;  %s29_s18 = int_to_ptr.vmem [resolvable:$true] %s28_s18 }
   0x7   :  { %31 = dma.hbm_to_vmem [thread:$0]  %s27_s16, 32, %s29_s18, [#allocation6]  }
   0x8   :  { %144 = dma.done.wait [#allocation3], 64  }
   0x9   :  { %145 = vsyncadd [#allocation3], 4294967232 }
   0xa   :  { %146 = dma.done.wait [#allocation6], 32  }
   0xb   :  { %147 = vsyncadd [#allocation6], 4294967264  ;;  %v41_v0 = vld [vmem:[#allocation5] sm:$0x3]  ;;  %vm46_vm0 = vcmask 1041408   ;;  %s152_s0 = smov [#allocation7]  }
   0xc   :  { %v43_v1 = vperm.slane %v41_v0, 0  ;;  %v44_v2 = vperm.slane %v41_v0, 1  ;;  %v40_v3 = vld [vmem:[#allocation2] sm:$0xf]  ;;  %s56_s19 = sshll.u32 %s152_s0, 4  ;;  %s58_s21 = sshll.u32 %s179_s2, 4  ;;  %s57_s19 = int_to_ptr.vmem [resolvable:$true] %s56_s19  ;;  %s59_s21 = int_to_ptr.hbm [resolvable:$true] %s58_s21 }
   0xe   :  { %v45_v4 = vrot.slane %v44_v2, 6 }
  0x10   :  { %v47_v5 = vsel %vm46_vm0, %v43_v1, %v45_v4 }
  0x11   :  { %v49_v6 = vadd.f32 %v47_v5, %v40_v3 }
  0x13   :  { %50 = vst [vmem:[#allocation7] sm:$0xf] %v49_v6 }
  0x14   :  { %61 = dma.vmem_to_hbm [thread:$0]  %s57_s19, 64, %s59_s21, [#allocation4]  }
  0x15   :  { %148 = dma.done.wait [#allocation4], 64  }
  0x16   :  { %149 = vsyncadd [#allocation4], 4294967232 }
  0x17   :  { %66 = vsyncpa [#allocation3], 1 }
  0x18   :  { %67 = vsyncpa [#allocation6], 1 }
  0x19   :  { %68 = vsyncpa [#allocation4], 1 }

</bundles_post_ra>
